<compile_context>
chip_gen: v7x
topology: tpu7x:2x2x1
jax: 0.10.0
libtpu: 0.0.40
codegen_flags: <defaults>
</compile_context>

<pallas_src>
import math

import jax
import jax.numpy as jnp
from jax.experimental import pallas as pl
from jax.experimental.pallas import tpu as pltpu


def _dma_copy_kernel(x_hbm_ref, o_hbm_ref, sem):
    # Whole-array HBM -> HBM DMA: read once, write once. Pure bandwidth;
    # compute / MXU / VMEM are irrelevant for a materializing reshape copy.
    copy = pltpu.make_async_copy(x_hbm_ref, o_hbm_ref, sem)
    copy.start()
    copy.wait()


def _pallas_hbm_copy(x: jax.Array) -> jax.Array:
    """Materializes a fresh copy of `x` via a single HBM->HBM DMA."""
    return pl.pallas_call(
        _dma_copy_kernel,
        out_shape=jax.ShapeDtypeStruct(x.shape, x.dtype),
        in_specs=[pl.BlockSpec(memory_space=pl.ANY)],   # raw HBM ref, no auto-DMA
        out_specs=pl.BlockSpec(memory_space=pl.ANY),    # fresh HBM allocation
        scratch_shapes=[pltpu.SemaphoreType.DMA],
    )(x)


class NnReshape:
    """JAX equivalent of the PyTorch NnReshape module.

    Default: zero-cost metadata reshape (identical to torch .view on a
    contiguous tensor). Set materialize=True to force a fresh, materialized
    output buffer via a single Pallas HBM->HBM DMA copy.
    """

    def __init__(self, *args, materialize: bool = False,
                 min_pallas_bytes: int = 1 << 20):
        self.args = args                      # target shape (excluding batch); may contain -1
        self.materialize = materialize
        self.min_pallas_bytes = min_pallas_bytes

    def _resolve_shape(self, x):
        batch = x.shape[0]
        feat = math.prod(x.shape[1:])
        args = list(self.args)
        if -1 in args:
            idx = args.index(-1)
            known = math.prod(a for a in args if a != -1)
            args[idx] = feat // known
        assert math.prod(args) == feat, (
            f"cannot view {x.shape} as {(batch,) + tuple(args)}"
        )
        return (batch,) + tuple(args)

    def __call__(self, x):
        out_shape = self._resolve_shape(x)
        y = jnp.reshape(x, out_shape)          # free metadata reshape == torch .view
        if not self.materialize:
            return y
        total_bytes = math.prod(out_shape) * jnp.dtype(x.dtype).itemsize
        if total_bytes < self.min_pallas_bytes:
            # Tiny slab: plain XLA copy is strictly faster than kernel launch.
            return jnp.copy(y)
        return _pallas_hbm_copy(y)             # fresh HBM buffer, one DMA


if __name__ == "__main__":
    # Example consistent with an NCHW conv feature map: (B=2, C=4, H=16, W=16).
    key = jax.random.PRNGKey(0)
    x = jax.random.normal(key, (2, 4, 16, 16), dtype=jnp.float32)
    expected = jnp.reshape(x, (2, 4, 256))

    # Default (hot) path: zero-cost metadata reshape, mirrors NnReshape(4, 256).
    y_view = NnReshape(4, 256)(x)
    jax.block_until_ready(y_view)
    assert y_view.shape == (2, 4, 256), y_view.shape
    assert y_view.dtype == x.dtype
    assert bool(jnp.array_equal(y_view, expected))

    # Materializing path: force the Pallas HBM->HBM DMA copy even for this
    # small example (min_pallas_bytes=0) so the kernel is exercised.
    y_mat = NnReshape(4, 256, materialize=True, min_pallas_bytes=0)(x)
    jax.block_until_ready(y_mat)
    assert y_mat.shape == (2, 4, 256), y_mat.shape
    assert y_mat.dtype == x.dtype
    assert bool(jnp.array_equal(y_mat, expected))

    # Non-128-aligned / sub-128 target shapes now also go through the single
    # DMA with no masked-store or VMEM-budget concerns.
    y_odd = NnReshape(16, 64, materialize=True, min_pallas_bytes=0)(x)
    jax.block_until_ready(y_odd)
    assert y_odd.shape == (2, 16, 64), y_odd.shape
    assert bool(jnp.array_equal(y_odd, jnp.reshape(x, (2, 16, 64))))

    # -1 inference (view semantics), default free path.
    y_flat = NnReshape(-1)(x)
    jax.block_until_ready(y_flat)
    assert y_flat.shape == (2, 1024), y_flat.shape
    assert bool(jnp.array_equal(y_flat, jnp.reshape(x, (2, 1024))))

    print("KERNEL_OK")
</pallas_src>

<mosaic_0001>
module attributes {stable_mosaic.version = 11 : i64} {
  func.func @_dma_copy_kernel(%arg0: memref<2x4x256xf32, #tpu.memory_space<any>>, %arg1: memref<2x4x256xf32, #tpu.memory_space<any>>, %arg2: memref<!tpu.dma_semaphore, #tpu.memory_space<semaphore_mem>>) attributes {dimension_semantics = [], scalar_prefetch = 0 : i64, scratch_operands = 1 : i64, tpu.core_type = #tpu.core_type<tc>} {
    tpu.enqueue_dma source(%arg0 : memref<2x4x256xf32, #tpu.memory_space<any>>) target(%arg1 : memref<2x4x256xf32, #tpu.memory_space<any>>) target_semaphore(%arg2 : memref<!tpu.dma_semaphore, #tpu.memory_space<semaphore_mem>>)
    tpu.wait_dma2 semaphore(%arg2 : memref<!tpu.dma_semaphore, #tpu.memory_space<semaphore_mem>>) src(%arg0 : memref<2x4x256xf32, #tpu.memory_space<any>>) dst(%arg1 : memref<2x4x256xf32, #tpu.memory_space<any>>)
    return
  }
}

</mosaic_0001>

<bundles_post_ra>
// kernel: tpu_custom_call.1
= control target key start
LH: loop header
LB: loop body
LE: loop exit
PB: predicated region body
PF: predicated region fallthrough
CT: control target
= control target key end

     0   :  { %s36_s6 = smov [#allocation2]   ;;  %s37_s7 = smov [#allocation3]   ;;  %s55_s0 = inlined_call_operand.hbm [shape: f32[2,4,256], index: 0, kind: input, shape index: {}]   ;;  %s56_s1 = inlined_call_operand.hbm [shape: f32[2,4,256], index: 1, kind: output, shape index: {}]  }
   0x1   :  { %s38_s8 = smov 0  }
   0x2   :  { %18 = dma.general %s55_s0, 256, %s56_s1, %s36_s6, %s37_s7, [#allocation4], %s38_s8, 0  }
   0x3   :  { %34 = dma.done.wait [#allocation2], 256 }
   0x4   :  { %35 = vsyncadd [#allocation2], 4294967040 }
   0x5   :  { %24 = vsyncmov [#allocation2] }
   0x8   :  { %s25_s13 = vpop.sfrf %24 }
   0x9   :  { %p30_p0 = scmp.ne.s32.totalorder %s25_s13, 0 }
   0xb   :  { %29 = shalt.err (%p30_p0)  }

</bundles_post_ra>
